<compile_context>
chip_gen: v5e
topology: v5e:2x2
jax: 0.10.0
libtpu: 0.0.40
codegen_flags: <defaults>
</compile_context>

<pallas_src>
import jax
import jax.numpy as jnp
from jax.experimental import pallas as pl
from jax.experimental.pallas import tpu as pltpu


def _sigmoid_kernel(x_ref, o_ref):
    # Compute in f32 (no-op for f32 inputs; avoids bf16 VPU/EUP issues on v5e).
    xf = x_ref[...].astype(jnp.float32)
    o_ref[...] = jax.nn.sigmoid(xf).astype(o_ref.dtype)


def sigmoid_pallas(x: jax.Array) -> jax.Array:
    """Elementwise sigmoid over an arbitrary-shaped tensor via a Pallas TPU kernel."""
    orig_shape = x.shape
    orig_dtype = x.dtype
    n = x.size

    lanes = 128
    rows = -(-n // lanes)  # ceil
    pad = rows * lanes - n

    flat = x.reshape(-1)
    if pad:
        # Dormant for the 2304-element case (2304 == 18 * 128); only hit for
        # sizes that are not a multiple of 128 lanes.
        flat = jnp.pad(flat, (0, pad))
    x2d = flat.reshape(rows, lanes)

    # Grid-less pallas_call: whole (rows, 128) slab lives in VMEM for one
    # kernel invocation — no pipeline prologue/epilogue, no per-step overhead.
    out2d = pl.pallas_call(
        _sigmoid_kernel,
        out_shape=jax.ShapeDtypeStruct((rows, lanes), orig_dtype),
        in_specs=[pl.BlockSpec(memory_space=pltpu.MemorySpace.VMEM)],
        out_specs=pl.BlockSpec(memory_space=pltpu.MemorySpace.VMEM),
    )(x2d)

    if pad:
        out = out2d.reshape(-1)[:n].reshape(orig_shape)
    else:
        out = out2d.reshape(orig_shape)
    return out


if __name__ == "__main__":
    key = jax.random.PRNGKey(0)
    # Matches the module's implied input: torch.randn([1, 2304, 1, 1])
    x645 = jax.random.normal(key, (1, 2304, 1, 1), dtype=jnp.float32)

    y = sigmoid_pallas(x645)
    y = jax.block_until_ready(y)

    # Sanity check against plain JAX.
    ref = jax.nn.sigmoid(x645)
    assert y.shape == (1, 2304, 1, 1)
    assert y.dtype == x645.dtype
    assert jnp.allclose(y, ref, atol=1e-6, rtol=1e-6)

    print("KERNEL_OK")
</pallas_src>

<mosaic_0001>
module attributes {stable_mosaic.version = 11 : i64} {
  func.func @_sigmoid_kernel(%arg0: memref<18x128xf32, #tpu.memory_space<vmem>>, %arg1: memref<18x128xf32, #tpu.memory_space<vmem>>) attributes {dimension_semantics = [], scalar_prefetch = 0 : i64, scratch_operands = 0 : i64, tpu.core_type = #tpu.core_type<tc>} {
    %c0 = arith.constant 0 : index
    %c0_0 = arith.constant 0 : index
    %0 = vector.load %arg0[%c0, %c0_0] : memref<18x128xf32, #tpu.memory_space<vmem>>, vector<18x128xf32>
    %1 = arith.negf %0 : vector<18x128xf32>
    %2 = math.exp %1 : vector<18x128xf32>
    %cst = arith.constant 1.000000e+00 : f32
    %3 = vector.broadcast %cst : f32 to vector<18x128xf32>
    %4 = arith.addf %3, %2 : vector<18x128xf32>
    %5 = arith.divf %3, %4 : vector<18x128xf32>
    %c0_1 = arith.constant 0 : index
    %c0_2 = arith.constant 0 : index
    %6 = vector.load %arg1[%c0_1, %c0_2] : memref<18x128xf32, #tpu.memory_space<vmem>>, vector<18x128xf32>
    tpu.vector_store %arg1[%c0_1, %c0_2], %5 {strides = array<i32>} : memref<18x128xf32, #tpu.memory_space<vmem>>, vector<18x128xf32>,
    return
  }
}

</mosaic_0001>

<bundles_post_ra>
// kernel: tpu_custom_call.1
= control target key start
LH: loop header
LB: loop body
LE: loop exit
PB: predicated region body
PF: predicated region fallthrough
CT: control target
= control target key end

     0   :  { %6 = vsyncpa [#allocation3], 0  ;;  %s216_s0 = inlined_call_operand.hbm [shape: f32[18,128], index: 0, kind: input, shape index: {}]   ;;  %s217_s1 = inlined_call_operand.hbm [shape: f32[18,128], index: 1, kind: output, shape index: {}]  }
   0x1   :  { %7 = vsyncpa [#allocation4], 0  ;;  %s12_s8 = sshll.u32 %s216_s0, 4  ;;  %s178_s9 = smov [#allocation2]   ;;  %s13_s8 = int_to_ptr.hbm [resolvable:$true] %s12_s8 }
   0x2   :  { %s14_s10 = sshll.u32 %s178_s9, 4  ;;  %s179_s11 = smov 128   ;;  %s15_s10 = int_to_ptr.vmem [resolvable:$true] %s14_s10 }
   0x3   :  { %s180_s12 = smov 8  }
   0x4   :  { %20 = dma.hbm_to_vmem [thread:$0]  %s13_s8, 384, %s15_s10, [#allocation3], %s179_s11, %s179_s11, %s180_s12  }
   0x5   :  { %174 = dma.done.wait [#allocation3], 384  }
   0x6   :  { %175 = vsyncadd [#allocation3], 4294966912  ;;  %v25_v0 = vld [vmem:[#allocation2] sm:$0xff]  ;;  %v26_v1 = vld [vmem:[#allocation2 + $0x8] sm:$0xff]  ;;  %s181_s0 = smov [#allocation5]   ;;  %s94_s16 = sshll.u32 %s217_s1, 4  ;;  %s95_s16 = int_to_ptr.hbm [resolvable:$true] %s94_s16 }
   0x7   :  { %v27_v2 = vld [vmem:[#allocation2 + $0x10] sm:$0x3]  ;;  %v107_v3 = vmul.f32 -1.442695, %v25_v0  ;;  %v108_v4 = vmul.f32 -1.442695, %v26_v1 }
   0x8   :  { %v109_v5 = vmul.f32 -1.442695, %v27_v2  ;;  %s92_s13 = sshll.u32 %s181_s0, 4  ;;  %s93_s13 = int_to_ptr.vmem [resolvable:$true] %s92_s13 }
   0x9   :  { %114 = vpow2.f32 %v107_v3 }
   0xa   :  { %116 = vpow2.f32 %v108_v4 }
   0xb   :  { %118 = vpow2.f32 %v109_v5 }
   0xf   :  { %v115_v6 = vpop.eup %114 }
  0x10   :  { %v117_v7 = vpop.eup %116  ;;  %v37_v8 = vadd.f32 1.0, %v115_v6 }
  0x11   :  { %v119_v9 = vpop.eup %118  ;;  %v38_v10 = vadd.f32 1.0, %v117_v7 }
  0x12   :  { %120 = vrcp.f32 %v37_v8  ;;  %v39_v11 = vadd.f32 1.0, %v119_v9  ;;  %v49_v15 = vand.u32 2147483647, %v37_v8  ;;  %v51_v16 = vand.u32 2147483648, %v37_v8 }
  0x13   :  { %122 = vrcp.f32 %v38_v10  ;;  %v66_v18 = vand.u32 2147483648, %v38_v10  ;;  %vm45_vm0 = vweird.f32 %v37_v8  ;;  %vm60_vm2 = vweird.f32 %v38_v10 }
  0x14   :  { %124 = vrcp.f32 %v39_v11  ;;  %v64_v22 = vand.u32 2147483647, %v38_v10  ;;  %vm198_vm4 = vcmp.eq.f32.partialorder %v49_v15, 8.507059e+37  ;;  %v52_v25 = vor.u32 1.1754944e-38, %v51_v16 }
  0x15   :  { %v67_v28 = vor.u32 1.1754944e-38, %v66_v18  ;;  %vm75_vm6 = vweird.f32 %v39_v11  ;;  %v81_v29 = vand.u32 2147483648, %v39_v11  ;;  %v79_v33 = vand.u32 2147483647, %v39_v11 }
  0x16   :  { %vm65_vm9 = vcmp.eq.f32.partialorder %v64_v22, 8.507059e+37 }
  0x17   :  { %v82_v39 = vor.u32 1.1754944e-38, %v81_v29  ;;  %vm80_vm11 = vcmp.eq.f32.partialorder %v79_v33, 8.507059e+37 }
  0x18   :  { %v121_v12 = vpop.eup %120 }
  0x19   :  { %v123_v13 = vpop.eup %122  ;;  %v41_v14 = vmul.f32 %v121_v12, %v37_v8  ;;  %vm46_vm1 = vweird.f32 %v121_v12 }
  0x1a   :  { %v56_v17 = vmul.f32 %v123_v13, %v38_v10  ;;  %v125_v20 = vpop.eup %124  ;;  %vm61_vm3 = vweird.f32 %v123_v13  ;;  %vm47_vm5 = vmor %vm45_vm0, %vm46_vm1 }
  0x1b   :  { %v42_v19 = vsub.f32 1.0, %v41_v14  ;;  %v71_v26 = vmul.f32 %v125_v20, %v39_v11  ;;  %vm202_vm7 = vmor %vm60_vm2, %vm61_vm3  ;;  %vm76_vm8 = vweird.f32 %v125_v20 }
  0x1c   :  { %v57_v21 = vsub.f32 1.0, %v56_v17  ;;  %vm77_vm10 = vmor %vm75_vm6, %vm76_vm8 }
  0x1d   :  { %v43_v23 = vmul.f32 %v121_v12, %v42_v19  ;;  %v72_v32 = vsub.f32 1.0, %v71_v26 }
  0x1e   :  { %v58_v27 = vmul.f32 %v123_v13, %v57_v21 }
  0x1f   :  { %v44_v30 = vadd.f32 %v121_v12, %v43_v23  ;;  %v73_v36 = vmul.f32 %v125_v20, %v72_v32 }
  0x20   :  { %v59_v34 = vadd.f32 %v123_v13, %v58_v27 }
  0x21   :  { %v48_v35 = vsel %vm47_vm5, %v121_v12, %v44_v30  ;;  %v74_v41 = vadd.f32 %v125_v20, %v73_v36 }
  0x22   :  { %v53_v37 = vsel %vm198_vm4, %v52_v25, %v48_v35  ;;  %v63_v38 = vsel %vm202_vm7, %v123_v13, %v59_v34 }
  0x23   :  { %85 = vst [vmem:[#allocation5] sm:$0xff] %v53_v37  ;;  %v68_v40 = vsel %vm65_vm9, %v67_v28, %v63_v38  ;;  %v78_v42 = vsel %vm77_vm10, %v125_v20, %v74_v41 }
  0x24   :  { %86 = vst [vmem:[#allocation5 + $0x8] sm:$0xff] %v68_v40  ;;  %v83_v43 = vsel %vm80_vm11, %v82_v39, %v78_v42 }
  0x25   :  { %87 = vst [vmem:[#allocation5 + $0x10] sm:$0x3] %v83_v43 }
  0x26   :  { %100 = dma.vmem_to_hbm [thread:$0]  %s93_s13, 384, %s95_s16, [#allocation4], %s179_s11, %s179_s11, %s180_s12  }
  0x27   :  { %176 = dma.done.wait [#allocation4], 384  }
  0x28   :  { %177 = vsyncadd [#allocation4], 4294966912 }
  0x29   :  { %105 = vsyncpa [#allocation3], 1 }
  0x2a   :  { %106 = vsyncpa [#allocation4], 1 }

</bundles_post_ra>
